<compile_context>
chip_gen: v7x
topology: tpu7x:2x2x1
jax: 0.10.0
libtpu: 0.0.40
codegen_flags: <defaults>
</compile_context>

<pallas_src>
import jax
import jax.numpy as jnp
from jax.experimental import pallas as pl
from jax.experimental.pallas import tpu as pltpu


_LANE = 128      # last-dim alignment (vreg lanes / MXU columns)


def _round_up(x, m):
    return (x + m - 1) // m * m


# ---------------------------------------------------------------------------
# Kernel
# ---------------------------------------------------------------------------
def _linear_decompose_kernel(*refs):
    """Fused chain of (h @ W + b) steps on one (TM, NF) batch tile.

    refs = (x_ref, w1, b1, w2, b2, ..., wk, bk, o_ref).
    Weights/biases are whole-array VMEM residents (fetched once for the whole
    grid); only the x / out tiles stream through the Pallas pipeline.
    Matmuls accumulate in f32; MXU input precision is taken from the weight
    dtype (f32 weights = exact parity with PyTorch, bf16 = fast path).
    """
    x_ref = refs[0]
    o_ref = refs[-1]
    param_refs = refs[1:-1]

    h = x_ref[...].astype(jnp.float32)
    for i in range(0, len(param_refs), 2):
        w_ref, b_ref = param_refs[i], param_refs[i + 1]
        lhs = h.astype(w_ref.dtype)            # no-op on the exact f32 path
        h = jnp.dot(lhs, w_ref[...],
                    preferred_element_type=jnp.float32) + b_ref[...].astype(jnp.float32)
    o_ref[...] = h.astype(o_ref.dtype)


# ---------------------------------------------------------------------------
# Host-side parameter prep
# ---------------------------------------------------------------------------
def precompose_middle(params):
    """Fold layers 2..5 (no activations in between) into a single affine.
    Returns 3 (W, b) pairs: W1, W2@W3@W4@W5 (+ folded bias), W6.
    Rounding order differs slightly from the layer-by-layer PyTorch module."""
    (w1, b1) = params[0]
    (w6, b6) = params[-1]
    w_mid, b_mid = params[1]
    for w, b in params[2:-1]:
        b_mid = b_mid @ w + b
        w_mid = w_mid @ w
    return [(w1, b1), (w_mid, b_mid), (w6, b6)]


def pad_params(params, *, weight_dtype=jnp.float32):
    """Zero-pad weights to [round_up(in,128), round_up(out,128)] and biases to
    [1, round_up(out,128)].  Zero padding keeps the math exact: padded columns
    of every intermediate stay identically zero through all layers.
    `weight_dtype=jnp.bfloat16` pre-casts weights host-side (bf16 MXU path);
    biases stay f32 (added after f32 accumulation)."""
    padded = []
    for w, b in params:
        fi, fo = w.shape
        fip, fop = _round_up(fi, _LANE), _round_up(fo, _LANE)
        wp = jnp.zeros((fip, fop), jnp.float32).at[:fi, :fo].set(w)
        bp = jnp.zeros((1, fop), jnp.float32).at[:, :fo].set(b)
        padded.append((wp.astype(weight_dtype), bp))
    return padded


# ---------------------------------------------------------------------------
# VMEM budgeting / tile selection
# ---------------------------------------------------------------------------
def _vmem_cap_bytes():
    """Generation-aware scoped-VMEM cap.  v5e/v6e: 128 MiB physical per core;
    v7x: 64 MiB per TensorCore (weights are resident per-TC).  Best-effort
    sniff of the device kind; falls back to a safe-everywhere 56 MiB."""
    try:
        kind = jax.devices()[0].device_kind.lower()
    except Exception:
        return 56 << 20
    if "v7" in kind:
        return 56 << 20
    if "v5" in kind or "v6" in kind:
        return 104 << 20
    return 56 << 20


def _pick_tm(b, nf_in_pad, nf_out_pad, weight_bytes, vmem_cap, row_align,
             max_tm=512):
    """Largest batch tile (multiple of row_align, capped at max_tm) whose
    double-buffered x/out tiles fit next to the resident weights."""
    b_al = _round_up(b, row_align)
    per_row = 2 * 4 * (nf_in_pad + nf_out_pad)          # 2x-buffered f32 x + out
    budget = max(vmem_cap - weight_bytes - (4 << 20), per_row * row_align)
    tm_fit = max(row_align, (budget // per_row) // row_align * row_align)
    tm = min(max_tm, tm_fit, b_al)
    # v7x has 2 TensorCores: prefer an even number of grid steps so neither idles.
    steps = -(-b_al // tm)
    if steps > 1 and steps % 2 == 1:
        tm_even = _round_up(-(-b_al // (steps + 1)), row_align)
        tm = max(row_align, min(tm, tm_even))
    return tm


# ---------------------------------------------------------------------------
# Forward
# ---------------------------------------------------------------------------
def linear_decompose_forward(x, padded_params):
    """x: [B, N, F] float32.  padded_params: lane-padded (W[in,out], b[1,out])
    pairs from pad_params (optionally precomposed)."""
    B, N, F = x.shape
    nf = N * F                                   # logical in/out feature dim
    nf_in_pad = padded_params[0][0].shape[0]
    nf_out_pad = padded_params[-1][0].shape[1]
    assert nf_in_pad == _round_up(nf, _LANE), "padded params do not match x"
    assert nf_out_pad >= nf, "decoder output dim must cover N*F"

    weight_bytes = sum(w.size * w.dtype.itemsize + b.size * b.dtype.itemsize
                       for w, b in padded_params)
    bf16_weights = any(w.dtype == jnp.bfloat16 for w, _ in padded_params)
    row_align = 16 if bf16_weights else 8        # bf16 packs 2 rows per sublane

    vmem_cap = _vmem_cap_bytes()
    tm = _pick_tm(B, nf_in_pad, nf_out_pad, weight_bytes, vmem_cap, row_align)
    b_pad = _round_up(B, tm)
    grid = (b_pad // tm,)

    # Pad x only when needed (skip the extra HBM pass if already aligned).
    x_flat = x.reshape(B, nf).astype(jnp.float32)
    if b_pad == B and nf_in_pad == nf:
        x_pad = x_flat
    else:
        x_pad = jnp.zeros((b_pad, nf_in_pad), jnp.float32).at[:B, :nf].set(x_flat)

    flat_args = [x_pad]
    for w, b in padded_params:
        flat_args.append(w)
        flat_args.append(b)

    # Advisory cost estimate so XLA schedules/overlaps around the custom call.
    flops = 2 * b_pad * sum(w.shape[0] * w.shape[1] for w, _ in padded_params)
    bytes_accessed = (x_pad.size * x_pad.dtype.itemsize
                      + b_pad * nf_out_pad * 4
                      + weight_bytes)
    cost = pl.CostEstimate(flops=flops, transcendentals=0,
                           bytes_accessed=bytes_accessed)

    # VMEM budget: weights single-buffered residents + double-buffered x/out
    # tiles + slack; capped per generation (no blind 48 MiB clamp).
    tile_bytes = 2 * tm * nf_in_pad * 4 + 2 * tm * nf_out_pad * 4
    vmem_limit = int(min(max(weight_bytes + tile_bytes + (4 << 20), 16 << 20),
                         vmem_cap))

    # TODO(synk): for very large N*F where W1/W6 alone approach the per-TC VMEM
    # budget (v7x), stream W1/W6 with a K-tiled inner pipeline instead of
    # whole-array residency; not needed at these shapes.
    out_pad = pl.pallas_call(
        _linear_decompose_kernel,
        out_shape=jax.ShapeDtypeStruct((b_pad, nf_out_pad), x.dtype),
        grid_spec=pltpu.PrefetchScalarGridSpec(
            num_scalar_prefetch=0,
            grid=grid,
            in_specs=[pl.BlockSpec((tm, nf_in_pad), lambda i: (i, 0))]
                     + [pl.BlockSpec(memory_space=pltpu.VMEM)] * (len(flat_args) - 1),
            out_specs=pl.BlockSpec((tm, nf_out_pad), lambda i: (i, 0)),
        ),
        compiler_params=pltpu.CompilerParams(
            dimension_semantics=("parallel",),
            vmem_limit_bytes=vmem_limit),
        cost_estimate=cost,
    )(*flat_args)

    out = out_pad
    if nf_out_pad != nf:
        out = out[:, :nf]
    if b_pad != B:
        out = out[:B]
    return out.reshape(B, N, F)


# ---------------------------------------------------------------------------
# Init / reference
# ---------------------------------------------------------------------------
def init_params(key, input_dim, node_num, hidden_layer1, hidden_layer2,
                hidden_size, output_dim):
    """PyTorch-Linear-style init (uniform +-1/sqrt(fan_in)).
    Weights stored pre-transposed as [in, out]; biases as [1, out]."""
    dims = [
        (input_dim * node_num, hidden_layer1),
        (hidden_layer1, hidden_layer2),
        (hidden_layer2, hidden_size),
        (hidden_size, hidden_layer2),
        (hidden_layer2, hidden_layer1),
        (hidden_layer1, output_dim * node_num),
    ]
    params = []
    for (fan_in, fan_out) in dims:
        key, kw, kb = jax.random.split(key, 3)
        bound = 1.0 / (fan_in ** 0.5)
        w = jax.random.uniform(kw, (fan_in, fan_out), jnp.float32, -bound, bound)
        b = jax.random.uniform(kb, (1, fan_out), jnp.float32, -bound, bound)
        params.append((w, b))
    return params


def reference_forward(x, params):
    """Plain-JAX reference for the sanity check."""
    B, N, F = x.shape
    h = x.reshape(B, N * F).astype(jnp.float32)
    for w, b in params:
        h = h @ w + b
    return h.reshape(B, N, F)


if __name__ == "__main__":
    # Small shapes consistent with the module's forward:
    #   x: [B, N, F] with input_dim == output_dim == F, node_num == N.
    B, N, F = 2, 4, 8                 # batch=2, node_num=4, input_dim=8
    hidden_layer1, hidden_layer2, hidden_size = 32, 16, 8
    output_dim = F                    # required so reshape(b, n, f) is valid

    key = jax.random.PRNGKey(0)
    key, kx = jax.random.split(key)
    x = jax.random.normal(kx, (B, N, F), jnp.float32)

    params = init_params(key, F, N, hidden_layer1, hidden_layer2,
                         hidden_size, output_dim)
    ref = reference_forward(x, params)

    # 1) Exact-precision path (f32 weights, layer-by-layer): matches PyTorch.
    out = linear_decompose_forward(x, pad_params(params))
    out = jax.block_until_ready(out)
    assert out.shape == (B, N, F)
    assert jnp.allclose(out, ref, atol=1e-4, rtol=1e-4), "f32 kernel mismatch"

    # 2) bf16 MXU-input fast path (valid on v5e/v6e/v7x): weights pre-cast
    #    host-side, f32 accumulation + f32 bias; looser tolerance.
    out_bf16 = linear_decompose_forward(
        x, pad_params(params, weight_dtype=jnp.bfloat16))
    out_bf16 = jax.block_until_ready(out_bf16)
    assert out_bf16.shape == (B, N, F)
    assert jnp.allclose(out_bf16, ref, atol=5e-2, rtol=5e-2), "bf16 kernel drift"

    # 3) Precomposed middle layers (3 matmuls instead of 6) -- fastest at these
    #    tiny hidden dims; rounding order differs slightly from PyTorch.
    out_pc = linear_decompose_forward(x, pad_params(precompose_middle(params)))
    out_pc = jax.block_until_ready(out_pc)
    assert out_pc.shape == (B, N, F)
    assert jnp.allclose(out_pc, ref, atol=1e-3, rtol=1e-3), "precomposed drift"

    print("KERNEL_OK")
</pallas_src>

<mosaic_0001>
module attributes {stable_mosaic.version = 11 : i64} {
  func.func @_linear_decompose_kernel(%arg0: i32, %arg1: memref<8x128xf32, #tpu.memory_space<vmem>>, %arg2: memref<128x128xf32, #tpu.memory_space<vmem>>, %arg3: memref<1x128xf32, #tpu.memory_space<vmem>>, %arg4: memref<128x128xf32, #tpu.memory_space<vmem>>, %arg5: memref<1x128xf32, #tpu.memory_space<vmem>>, %arg6: memref<128x128xf32, #tpu.memory_space<vmem>>, %arg7: memref<1x128xf32, #tpu.memory_space<vmem>>, %arg8: memref<128x128xf32, #tpu.memory_space<vmem>>, %arg9: memref<1x128xf32, #tpu.memory_space<vmem>>, %arg10: memref<128x128xf32, #tpu.memory_space<vmem>>, %arg11: memref<1x128xf32, #tpu.memory_space<vmem>>, %arg12: memref<128x128xf32, #tpu.memory_space<vmem>>, %arg13: memref<1x128xf32, #tpu.memory_space<vmem>>, %arg14: memref<8x128xf32, #tpu.memory_space<vmem>>) attributes {dimension_semantics = [#tpu.dimension_semantics<parallel>], iteration_bounds = array<i64: 1>, scalar_prefetch = 0 : i64, scratch_operands = 0 : i64, tpu.core_type = #tpu.core_type<tc>, window_params = [{transform_indices = @transform_0, window_bounds = array<i64: 8, 128>}, {pipeline_mode = #tpu.pipeline_mode<synchronous>, transform_indices = @transform_1, window_bounds = array<i64: 128, 128>}, {pipeline_mode = #tpu.pipeline_mode<synchronous>, transform_indices = @transform_2, window_bounds = array<i64: 1, 128>}, {pipeline_mode = #tpu.pipeline_mode<synchronous>, transform_indices = @transform_3, window_bounds = array<i64: 128, 128>}, {pipeline_mode = #tpu.pipeline_mode<synchronous>, transform_indices = @transform_4, window_bounds = array<i64: 1, 128>}, {pipeline_mode = #tpu.pipeline_mode<synchronous>, transform_indices = @transform_5, window_bounds = array<i64: 128, 128>}, {pipeline_mode = #tpu.pipeline_mode<synchronous>, transform_indices = @transform_6, window_bounds = array<i64: 1, 128>}, {pipeline_mode = #tpu.pipeline_mode<synchronous>, transform_indices = @transform_7, window_bounds = array<i64: 128, 128>}, {pipeline_mode = #tpu.pipeline_mode<synchronous>, transform_indices = @transform_8, window_bounds = array<i64: 1, 128>}, {pipeline_mode = #tpu.pipeline_mode<synchronous>, transform_indices = @transform_9, window_bounds = array<i64: 128, 128>}, {pipeline_mode = #tpu.pipeline_mode<synchronous>, transform_indices = @transform_10, window_bounds = array<i64: 1, 128>}, {pipeline_mode = #tpu.pipeline_mode<synchronous>, transform_indices = @transform_11, window_bounds = array<i64: 128, 128>}, {pipeline_mode = #tpu.pipeline_mode<synchronous>, transform_indices = @transform_12, window_bounds = array<i64: 1, 128>}, {transform_indices = @transform_13, window_bounds = array<i64: 8, 128>}]} {
    %c0 = arith.constant 0 : index
    %c0_0 = arith.constant 0 : index
    %0 = vector.load %arg1[%c0, %c0_0] : memref<8x128xf32, #tpu.memory_space<vmem>>, vector<8x128xf32>
    %c0_1 = arith.constant 0 : index
    %c0_2 = arith.constant 0 : index
    %1 = vector.load %arg2[%c0_1, %c0_2] : memref<128x128xf32, #tpu.memory_space<vmem>>, vector<128x128xf32>
    %cst = arith.constant dense<0.000000e+00> : vector<8x128xf32>
    %2 = tpu.matmul %0, %1, %cst {dimension_numbers = #tpu.dot_dimension_numbers<[1], [0], [0], [1], [0, 0, 1, 1], [], []>} : vector<8x128xf32>, vector<128x128xf32>, vector<8x128xf32> -> vector<8x128xf32>
    %c0_3 = arith.constant 0 : index
    %c0_4 = arith.constant 0 : index
    %3 = vector.load %arg3[%c0_3, %c0_4] : memref<1x128xf32, #tpu.memory_space<vmem>>, vector<1x128xf32>
    %4 = vector.broadcast %3 : vector<1x128xf32> to vector<8x128xf32>
    %5 = arith.addf %2, %4 : vector<8x128xf32>
    %c0_5 = arith.constant 0 : index
    %c0_6 = arith.constant 0 : index
    %6 = vector.load %arg4[%c0_5, %c0_6] : memref<128x128xf32, #tpu.memory_space<vmem>>, vector<128x128xf32>
    %cst_7 = arith.constant dense<0.000000e+00> : vector<8x128xf32>
    %7 = tpu.matmul %5, %6, %cst_7 {dimension_numbers = #tpu.dot_dimension_numbers<[1], [0], [0], [1], [0, 0, 1, 1], [], []>} : vector<8x128xf32>, vector<128x128xf32>, vector<8x128xf32> -> vector<8x128xf32>
    %c0_8 = arith.constant 0 : index
    %c0_9 = arith.constant 0 : index
    %8 = vector.load %arg5[%c0_8, %c0_9] : memref<1x128xf32, #tpu.memory_space<vmem>>, vector<1x128xf32>
    %9 = vector.broadcast %8 : vector<1x128xf32> to vector<8x128xf32>
    %10 = arith.addf %7, %9 : vector<8x128xf32>
    %c0_10 = arith.constant 0 : index
    %c0_11 = arith.constant 0 : index
    %11 = vector.load %arg6[%c0_10, %c0_11] : memref<128x128xf32, #tpu.memory_space<vmem>>, vector<128x128xf32>
    %cst_12 = arith.constant dense<0.000000e+00> : vector<8x128xf32>
    %12 = tpu.matmul %10, %11, %cst_12 {dimension_numbers = #tpu.dot_dimension_numbers<[1], [0], [0], [1], [0, 0, 1, 1], [], []>} : vector<8x128xf32>, vector<128x128xf32>, vector<8x128xf32> -> vector<8x128xf32>
    %c0_13 = arith.constant 0 : index
    %c0_14 = arith.constant 0 : index
    %13 = vector.load %arg7[%c0_13, %c0_14] : memref<1x128xf32, #tpu.memory_space<vmem>>, vector<1x128xf32>
    %14 = vector.broadcast %13 : vector<1x128xf32> to vector<8x128xf32>
    %15 = arith.addf %12, %14 : vector<8x128xf32>
    %c0_15 = arith.constant 0 : index
    %c0_16 = arith.constant 0 : index
    %16 = vector.load %arg8[%c0_15, %c0_16] : memref<128x128xf32, #tpu.memory_space<vmem>>, vector<128x128xf32>
    %cst_17 = arith.constant dense<0.000000e+00> : vector<8x128xf32>
    %17 = tpu.matmul %15, %16, %cst_17 {dimension_numbers = #tpu.dot_dimension_numbers<[1], [0], [0], [1], [0, 0, 1, 1], [], []>} : vector<8x128xf32>, vector<128x128xf32>, vector<8x128xf32> -> vector<8x128xf32>
    %c0_18 = arith.constant 0 : index
    %c0_19 = arith.constant 0 : index
    %18 = vector.load %arg9[%c0_18, %c0_19] : memref<1x128xf32, #tpu.memory_space<vmem>>, vector<1x128xf32>
    %19 = vector.broadcast %18 : vector<1x128xf32> to vector<8x128xf32>
    %20 = arith.addf %17, %19 : vector<8x128xf32>
    %c0_20 = arith.constant 0 : index
    %c0_21 = arith.constant 0 : index
    %21 = vector.load %arg10[%c0_20, %c0_21] : memref<128x128xf32, #tpu.memory_space<vmem>>, vector<128x128xf32>
    %cst_22 = arith.constant dense<0.000000e+00> : vector<8x128xf32>
    %22 = tpu.matmul %20, %21, %cst_22 {dimension_numbers = #tpu.dot_dimension_numbers<[1], [0], [0], [1], [0, 0, 1, 1], [], []>} : vector<8x128xf32>, vector<128x128xf32>, vector<8x128xf32> -> vector<8x128xf32>
    %c0_23 = arith.constant 0 : index
    %c0_24 = arith.constant 0 : index
    %23 = vector.load %arg11[%c0_23, %c0_24] : memref<1x128xf32, #tpu.memory_space<vmem>>, vector<1x128xf32>
    %24 = vector.broadcast %23 : vector<1x128xf32> to vector<8x128xf32>
    %25 = arith.addf %22, %24 : vector<8x128xf32>
    %c0_25 = arith.constant 0 : index
    %c0_26 = arith.constant 0 : index
    %26 = vector.load %arg12[%c0_25, %c0_26] : memref<128x128xf32, #tpu.memory_space<vmem>>, vector<128x128xf32>
    %cst_27 = arith.constant dense<0.000000e+00> : vector<8x128xf32>
    %27 = tpu.matmul %25, %26, %cst_27 {dimension_numbers = #tpu.dot_dimension_numbers<[1], [0], [0], [1], [0, 0, 1, 1], [], []>} : vector<8x128xf32>, vector<128x128xf32>, vector<8x128xf32> -> vector<8x128xf32>
    %c0_28 = arith.constant 0 : index
    %c0_29 = arith.constant 0 : index
    %28 = vector.load %arg13[%c0_28, %c0_29] : memref<1x128xf32, #tpu.memory_space<vmem>>, vector<1x128xf32>
    %29 = vector.broadcast %28 : vector<1x128xf32> to vector<8x128xf32>
    %30 = arith.addf %27, %29 : vector<8x128xf32>
    %c0_30 = arith.constant 0 : index
    %c0_31 = arith.constant 0 : index
    %31 = vector.load %arg14[%c0_30, %c0_31] : memref<8x128xf32, #tpu.memory_space<vmem>>, vector<8x128xf32>
    tpu.vector_store %arg14[%c0_30, %c0_31], %30 {strides = array<i32>} : memref<8x128xf32, #tpu.memory_space<vmem>>, vector<8x128xf32>,
    return
  }
  func.func @transform_0(%arg0: i32) -> (i32, i32) {
    %c0_i32 = arith.constant 0 : i32
    %c0_i32_0 = arith.constant 0 : i32
    return %arg0, %c0_i32 : i32, i32
  }
  func.func @transform_1(%arg0: i32) -> (i32, i32) {
    %c0_i32 = arith.constant 0 : i32
    %c0_i32_0 = arith.constant 0 : i32
    %c0_i32_1 = arith.constant 0 : i32
    return %c0_i32, %c0_i32_0 : i32, i32
  }
  func.func @transform_2(%arg0: i32) -> (i32, i32) {
    %c0_i32 = arith.constant 0 : i32
    %c0_i32_0 = arith.constant 0 : i32
    %c0_i32_1 = arith.constant 0 : i32
    return %c0_i32, %c0_i32_0 : i32, i32
  }
  func.func @transform_3(%arg0: i32) -> (i32, i32) {
    %c0_i32 = arith.constant 0 : i32
    %c0_i32_0 = arith.constant 0 : i32
    %c0_i32_1 = arith.constant 0 : i32
    return %c0_i32, %c0_i32_0 : i32, i32
  }
  func.func @transform_4(%arg0: i32) -> (i32, i32) {
    %c0_i32 = arith.constant 0 : i32
    %c0_i32_0 = arith.constant 0 : i32
    %c0_i32_1 = arith.constant 0 : i32
    return %c0_i32, %c0_i32_0 : i32, i32
  }
  func.func @transform_5(%arg0: i32) -> (i32, i32) {
    %c0_i32 = arith.constant 0 : i32
    %c0_i32_0 = arith.constant 0 : i32
    %c0_i32_1 = arith.constant 0 : i32
    return %c0_i32, %c0_i32_0 : i32, i32
  }
  func.func @transform_6(%arg0: i32) -> (i32, i32) {
    %c0_i32 = arith.constant 0 : i32
    %c0_i32_0 = arith.constant 0 : i32
    %c0_i32_1 = arith.constant 0 : i32
    return %c0_i32, %c0_i32_0 : i32, i32
  }
  func.func @transform_7(%arg0: i32) -> (i32, i32) {
    %c0_i32 = arith.constant 0 : i32
    %c0_i32_0 = arith.constant 0 : i32
    %c0_i32_1 = arith.constant 0 : i32
    return %c0_i32, %c0_i32_0 : i32, i32
  }
  func.func @transform_8(%arg0: i32) -> (i32, i32) {
    %c0_i32 = arith.constant 0 : i32
    %c0_i32_0 = arith.constant 0 : i32
    %c0_i32_1 = arith.constant 0 : i32
    return %c0_i32, %c0_i32_0 : i32, i32
  }
  func.func @transform_9(%arg0: i32) -> (i32, i32) {
    %c0_i32 = arith.constant 0 : i32
    %c0_i32_0 = arith.constant 0 : i32
    %c0_i32_1 = arith.constant 0 : i32
    return %c0_i32, %c0_i32_0 : i32, i32
  }
  func.func @transform_10(%arg0: i32) -> (i32, i32) {
    %c0_i32 = arith.constant 0 : i32
    %c0_i32_0 = arith.constant 0 : i32
    %c0_i32_1 = arith.constant 0 : i32
    return %c0_i32, %c0_i32_0 : i32, i32
  }
  func.func @transform_11(%arg0: i32) -> (i32, i32) {
    %c0_i32 = arith.constant 0 : i32
    %c0_i32_0 = arith.constant 0 : i32
    %c0_i32_1 = arith.constant 0 : i32
    return %c0_i32, %c0_i32_0 : i32, i32
  }
  func.func @transform_12(%arg0: i32) -> (i32, i32) {
    %c0_i32 = arith.constant 0 : i32
    %c0_i32_0 = arith.constant 0 : i32
    %c0_i32_1 = arith.constant 0 : i32
    return %c0_i32, %c0_i32_0 : i32, i32
  }
  func.func @transform_13(%arg0: i32) -> (i32, i32) {
    %c0_i32 = arith.constant 0 : i32
    %c0_i32_0 = arith.constant 0 : i32
    return %arg0, %c0_i32 : i32, i32
  }
}

</mosaic_0001>

<bundles_post_ra>
// kernel: tpu_custom_call.1
= control target key start
LH: loop header
LB: loop body
LE: loop exit
PB: predicated region body
PF: predicated region fallthrough
CT: control target
= control target key end

     0   :  { %18 = vsyncpa [#allocation3], 0  ;;  %s1652_s0 = inlined_call_operand.hbm [shape: f32[8,128], index: 0, kind: input, shape index: {}]   ;;  %s1653_s1 = inlined_call_operand.hbm [shape: f32[128,128], index: 1, kind: input, shape index: {}]   ;;  %s1654_s2 = inlined_call_operand.vmem [shape: f32[1,128], index: 2, kind: input, shape index: {}]   ;;  %s1655_s3 = inlined_call_operand.hbm [shape: f32[128,128], index: 3, kind: input, shape index: {}]   ;;  %s1656_s4 = inlined_call_operand.vmem [shape: f32[1,128], index: 4, kind: input, shape index: {}]   ;;  %s1657_s5 = inlined_call_operand.hbm [shape: f32[128,128], index: 5, kind: input, shape index: {}]   ;;  %s1658_s6 = inlined_call_operand.vmem [shape: f32[1,128], index: 6, kind: input, shape index: {}]   ;;  %s1659_s7 = inlined_call_operand.hbm [shape: f32[128,128], index: 7, kind: input, shape index: {}]   ;;  %s1660_s8 = inlined_call_operand.vmem [shape: f32[1,128], index: 8, kind: input, shape index: {}]   ;;  %s1661_s9 = inlined_call_operand.hbm [shape: f32[128,128], index: 9, kind: input, shape index: {}]   ;;  %s1662_s10 = inlined_call_operand.vmem [shape: f32[1,128], index: 10, kind: input, shape index: {}]   ;;  %s1663_s11 = inlined_call_operand.hbm [shape: f32[128,128], index: 11, kind: input, shape index: {}]   ;;  %s1664_s12 = inlined_call_operand.vmem [shape: f32[1,128], index: 12, kind: input, shape index: {}]   ;;  %s1665_s13 = inlined_call_operand.hbm [shape: f32[8,128], index: 13, kind: output, shape index: {}]  }
   0x1   :  { %19 = vsyncpa [#allocation6], 0 }
   0x2   :  { %20 = vsyncpa [#allocation9], 0 }
   0x3   :  { %21 = vsyncpa [#allocation12], 0 }
   0x4   :  { %22 = vsyncpa [#allocation4], 0  ;;  %s1377_s25 = smov [#allocation5]   ;;  %s1191_s29 = scalar_lea.hbm %s1653_s1, 2048 }
   0x5   :  { %s38_s26 = sshll.u32 %s1377_s25, 4  ;;  %p1192_p0 = scmp.ne.s32.totalorder %s1653_s1, %s1191_s29  ;;  %s39_s26 = int_to_ptr.vmem [resolvable:$true] %s38_s26 }
   0x6   :  { %p1195_p1 = scmp.lt.u32.totalorder %s1191_s29, %s1653_s1 }
   0x8   :  { %p1197_p2 = pnand %p1195_p1, %p1192_p0 }
   0xa   :  { %1200 = shalt.err (!%p1197_p2)
}
   0xb   :  { %s1201_s17 = scalar_lea.vmem %s39_s26, 2048  ;;  %p1206_p4 = scmp.lt.s32.totalorder %s39_s26, %s39_s26 }
   0xc   :  { %p1202_p3 = scmp.ne.s32.totalorder %s39_s26, %s1201_s17  ;;  %p1207_p5 = scmp.lt.s32.totalorder %s1201_s17, %s1201_s17 }
   0xe   :  { %p1208_p6 = por %p1207_p5, %p1206_p4 }
  0x10   :  { %p1209_p7 = pnand %p1208_p6, %p1202_p3 }
  0x12   :  { %1212 = shalt.err (!%p1209_p7)
}
  0x13   :  { %s1378_s18 = smov 128   ;;  %s1379_s19 = smov 8  }
  0x14   :  { %44 = dma.hbm_to_vmem [thread:$0]  %s1653_s1, 2048, %s39_s26, [#allocation6], %s1378_s18, %s1378_s18, %s1379_s19  }
  0x15   :  { %s1380_s22 = smov [#allocation8]   ;;  %s1381_s24 = smov [#allocation11]  }
  0x16   :  { %s66_s23 = sshll.u32 %s1380_s22, 4  ;;  %s94_s25 = sshll.u32 %s1381_s24, 4  ;;  %s67_s23 = int_to_ptr.vmem [resolvable:$true] %s66_s23  ;;  %s95_s25 = int_to_ptr.vmem [resolvable:$true] %s94_s25 }
  0x17   :  { %s1213_s29 = scalar_lea.hbm %s1657_s5, 2048 }
  0x18   :  { %p1214_p8 = scmp.ne.s32.totalorder %s1657_s5, %s1213_s29  ;;  %p1217_p9 = scmp.lt.u32.totalorder %s1213_s29, %s1657_s5 }
  0x1a   :  { %p1219_p10 = pnand %p1217_p9, %p1214_p8 }
  0x1c   :  { %1222 = shalt.err (!%p1219_p10)
}
  0x1d   :  { %s1223_s1 = scalar_lea.vmem %s67_s23, 2048  ;;  %p1228_p12 = scmp.lt.s32.totalorder %s67_s23, %s67_s23 }
  0x1e   :  { %p1224_p11 = scmp.ne.s32.totalorder %s67_s23, %s1223_s1  ;;  %p1229_p13 = scmp.lt.s32.totalorder %s1223_s1, %s1223_s1 }
  0x20   :  { %p1230_p0 = por %p1229_p13, %p1228_p12 }
  0x22   :  { %p1231_p1 = pnand %p1230_p0, %p1224_p11 }
  0x24   :  { %1234 = shalt.err (!%p1231_p1)
}
  0x25   :  { %72 = dma.hbm_to_vmem [thread:$0]  %s1657_s5, 2048, %s67_s23, [#allocation9], %s1378_s18, %s1378_s18, %s1379_s19  }
  0x26   :  { %s1235_s22 = scalar_lea.hbm %s1661_s9, 2048 }
  0x27   :  { %p1236_p2 = scmp.ne.s32.totalorder %s1661_s9, %s1235_s22  ;;  %p1239_p3 = scmp.lt.u32.totalorder %s1235_s22, %s1661_s9 }
  0x29   :  { %p1241_p4 = pnand %p1239_p3, %p1236_p2 }
  0x2b   :  { %1244 = shalt.err (!%p1241_p4)
}
  0x2c   :  { %s1245_s30 = scalar_lea.vmem %s95_s25, 2048  ;;  %p1250_p6 = scmp.lt.s32.totalorder %s95_s25, %s95_s25 }
  0x2d   :  { %p1246_p5 = scmp.ne.s32.totalorder %s95_s25, %s1245_s30  ;;  %p1251_p7 = scmp.lt.s32.totalorder %s1245_s30, %s1245_s30 }
  0x2f   :  { %p1252_p8 = por %p1251_p7, %p1250_p6 }
  0x31   :  { %p1253_p9 = pnand %p1252_p8, %p1246_p5 }
  0x33   :  { %1256 = shalt.err (!%p1253_p9)
}
  0x34   :  { %100 = dma.hbm_to_vmem [thread:$0]  %s1661_s9, 2048, %s95_s25, [#allocation12], %s1378_s18, %s1378_s18, %s1379_s19  }
  0x35   :  { %s1382_s14 = smov [#allocation2]   ;;  %s1383_s16 = smov [#allocation7]  }
  0x36   :  { %s29_s15 = sshll.u32 %s1382_s14, 4  ;;  %s52_s1 = sshll.u32 %s1383_s16, 4  ;;  %s30_s15 = int_to_ptr.vmem [resolvable:$true] %s29_s15  ;;  %s53_s1 = int_to_ptr.vmem [resolvable:$true] %s52_s1 }
  0x37   :  { %s1257_s20 = scalar_lea.hbm %s1652_s0, 128 }
  0x38   :  { %p1258_p10 = scmp.ne.s32.totalorder %s1652_s0, %s1257_s20  ;;  %p1261_p11 = scmp.lt.u32.totalorder %s1257_s20, %s1652_s0 }
  0x3a   :  { %p1263_p12 = pnand %p1261_p11, %p1258_p10 }
  0x3c   :  { %1266 = shalt.err (!%p1263_p12)
}
  0x3d   :  { %s1267_s9 = scalar_lea.vmem %s30_s15, 128  ;;  %p1272_p0 = scmp.lt.s32.totalorder %s30_s15, %s30_s15 }
  0x3e   :  { %p1268_p13 = scmp.ne.s32.totalorder %s30_s15, %s1267_s9  ;;  %p1273_p1 = scmp.lt.s32.totalorder %s1267_s9, %s1267_s9 }
  0x40   :  { %p1274_p2 = por %p1273_p1, %p1272_p0 }
  0x42   :  { %p1275_p3 = pnand %p1274_p2, %p1268_p13 }
  0x44   :  { %1278 = shalt.err (!%p1275_p3)
}
  0x45   :  { %32 = dma.hbm_to_vmem [thread:$0]  %s1652_s0, 128, %s30_s15, [#allocation3]  }
  0x46   :  { %s1279_s5 = scalar_lea.hbm %s1655_s3, 2048 }
  0x47   :  { %p1280_p4 = scmp.ne.s32.totalorder %s1655_s3, %s1279_s5  ;;  %p1283_p5 = scmp.lt.u32.totalorder %s1279_s5, %s1655_s3 }
  0x49   :  { %p1285_p6 = pnand %p1283_p5, %p1280_p4 }
  0x4b   :  { %1288 = shalt.err (!%p1285_p6)
}
  0x4c   :  { %s1289_s17 = scalar_lea.vmem %s53_s1, 2048  ;;  %p1294_p8 = scmp.lt.s32.totalorder %s53_s1, %s53_s1 }
  0x4d   :  { %p1290_p7 = scmp.ne.s32.totalorder %s53_s1, %s1289_s17  ;;  %p1295_p9 = scmp.lt.s32.totalorder %s1289_s17, %s1289_s17 }
  0x4f   :  { %p1296_p10 = por %p1295_p9, %p1294_p8 }
  0x51   :  { %p1297_p11 = pnand %p1296_p10, %p1290_p7 }
  0x53   :  { %1300 = shalt.err (!%p1297_p11)
}
  0x54   :  { %58 = dma.hbm_to_vmem [thread:$0]  %s1655_s3, 2048, %s53_s1, [#allocation6], %s1378_s18, %s1378_s18, %s1379_s19  }
  0x55   :  { %s1384_s20 = smov [#allocation10]   ;;  %s1385_s22 = smov [#allocation13]  }
  0x56   :  { %s80_s21 = sshll.u32 %s1384_s20, 4  ;;  %s108_s24 = sshll.u32 %s1385_s22, 4  ;;  %s81_s21 = int_to_ptr.vmem [resolvable:$true] %s80_s21  ;;  %s109_s24 = int_to_ptr.vmem [resolvable:$true] %s108_s24 }
  0x57   :  { %s1301_s25 = scalar_lea.hbm %s1659_s7, 2048 }
  0x58   :  { %p1302_p12 = scmp.ne.s32.totalorder %s1659_s7, %s1301_s25  ;;  %p1305_p13 = scmp.lt.u32.totalorder %s1301_s25, %s1659_s7 }
  0x5a   :  { %p1307_p0 = pnand %p1305_p13, %p1302_p12 }
  0x5c   :  { %1310 = shalt.err (!%p1307_p0)
}
  0x5d   :  { %s1311_s3 = scalar_lea.vmem %s81_s21, 2048  ;;  %p1316_p2 = scmp.lt.s32.totalorder %s81_s21, %s81_s21 }
  0x5e   :  { %p1312_p1 = scmp.ne.s32.totalorder %s81_s21, %s1311_s3  ;;  %p1317_p3 = scmp.lt.s32.totalorder %s1311_s3, %s1311_s3 }
  0x60   :  { %p1318_p4 = por %p1317_p3, %p1316_p2 }
  0x62   :  { %p1319_p5 = pnand %p1318_p4, %p1312_p1 }
  0x64   :  { %1322 = shalt.err (!%p1319_p5)
}
  0x65   :  { %86 = dma.hbm_to_vmem [thread:$0]  %s1659_s7, 2048, %s81_s21, [#allocation9], %s1378_s18, %s1378_s18, %s1379_s19  }
  0x66   :  { %s1323_s26 = scalar_lea.hbm %s1663_s11, 2048 }
  0x67   :  { %p1324_p6 = scmp.ne.s32.totalorder %s1663_s11, %s1323_s26  ;;  %p1327_p7 = scmp.lt.u32.totalorder %s1323_s26, %s1663_s11 }
  0x69   :  { %p1329_p8 = pnand %p1327_p7, %p1324_p6 }
  0x6b   :  { %1332 = shalt.err (!%p1329_p8)
}
  0x6c   :  { %s1333_s22 = scalar_lea.vmem %s109_s24, 2048  ;;  %p1338_p10 = scmp.lt.s32.totalorder %s109_s24, %s109_s24 }
  0x6d   :  { %p1334_p9 = scmp.ne.s32.totalorder %s109_s24, %s1333_s22  ;;  %p1339_p11 = scmp.lt.s32.totalorder %s1333_s22, %s1333_s22 }
  0x6f   :  { %p1340_p12 = por %p1339_p11, %p1338_p10 }
  0x71   :  { %p1341_p13 = pnand %p1340_p12, %p1334_p9 }
  0x73   :  { %1344 = shalt.err (!%p1341_p13)
}
  0x74   :  { %114 = dma.hbm_to_vmem [thread:$0]  %s1663_s11, 2048, %s109_s24, [#allocation12], %s1378_s18, %s1378_s18, %s1379_s19  }
  0x75   :  { %1367 = dma.done.wait [#allocation3], 128  }
  0x76   :  { %1368 = vsyncadd [#allocation3], 4294967168 }
  0x77   :  { %1369 = dma.done.wait [#allocation6], 4096  }
  0x78   :  { %1370 = vsyncadd [#allocation6], 4294963200 }
  0x79   :  { %1371 = dma.done.wait [#allocation9], 4096  }
  0x7a   :  { %1372 = vsyncadd [#allocation9], 4294963200 }
  0x7b   :  { %1373 = dma.done.wait [#allocation12], 4096  }
  0x7c   :  { %1374 = vsyncadd [#allocation12], 4294963200  ;;  %v1386_v0 = vmov 0.0|0.0   ;;  %vm1387_vm0 = vmmov 0   ;;  %v1388_v1 = vmov 0.0   ;;  %v139_v2 = vld [vmem:[#allocation5] sm:$0xff] }
  0x7d   :  { %1034 = vmatprep.subr.bf16.mxu0 %v1386_v0  ;;  %856 = vmatprep.mubr.msk.f32.mxu0 %vm1387_vm0, %v1388_v1  ;;  %v140_v3 = vld [vmem:[#allocation5 + $0x8] sm:$0xff]  ;;  %v141_v4 = vld [vmem:[#allocation5 + $0x10] sm:$0xff]  ;;  %v142_v6 = vld [vmem:[#allocation5 + $0x18] sm:$0xff] }
  0x7e   :  { %1058 = vmatprep.subr.bf16.mxu1 %v1386_v0  ;;  %891 = vmatprep.mubr.msk.f32.mxu1 %vm1387_vm0, %v1388_v1  ;;  %v1035_v5 = vpack.c.bf16 %v140_v3, %v139_v2  ;;  %v1038_v7 = vpack.c.bf16 %v142_v6, %v141_v4  ;;  %v143_v8 = vld [vmem:[#allocation5 + $0x20] sm:$0xff]  ;;  %v144_v9 = vld [vmem:[#allocation5 + $0x28] sm:$0xff]  ;;  %v234_v12 = vld [vmem:[#allocation7 + $0x10] sm:$0xff] }
  0x7f   :  { %v232_v10 = vld [vmem:[#allocation7] sm:$0xff]  ;;  %v233_v11 = vld [vmem:[#allocation7 + $0x8] sm:$0xff]  ;;  %v235_v13 = vld [vmem:[#allocation7 + $0x18] sm:$0xff]  ;;  %v1041_v14 = vpack.c.bf16 %v144_v9, %v143_v8 }
  0x80   :  { %1036 = vmatpush3.bf16.msra.mxu0 %v1035_v5  ;;  %v1059_v15 = vpack.c.bf16 %v233_v11, %v232_v10  ;;  %v145_v16 = vld [vmem:[#allocation5 + $0x30] sm:$0xff]  ;;  %v146_v17 = vld [vmem:[#allocation5 + $0x38] sm:$0xff]  ;;  %v1062_v18 = vpack.c.bf16 %v235_v13, %v234_v12  ;;  %v236_v19 = vld [vmem:[#allocation7 + $0x20] sm:$0xff] }
  0x81   :  { %1037 = vmatprep.subr.bf16.mxu0 %v1386_v0  ;;  %v237_v20 = vld [vmem:[#allocation7 + $0x28] sm:$0xff]  ;;  %v1044_v21 = vpack.c.bf16 %v146_v17, %v145_v16  ;;  %v147_v22 = vld [vmem:[#allocation5 + $0x40] sm:$0xff]  ;;  %v238_v25 = vld [vmem:[#allocation7 + $0x30] sm:$0xff] }
  0x82   :  { %1060 = vmatpush3.bf16.msra.mxu1 %v1059_v15  ;;  %v148_v23 = vld [vmem:[#allocation5 + $0x48] sm:$0xff]  ;;  %v1065_v24 = vpack.c.bf16 %v237_v20, %v236_v19  ;;  %v239_v26 = vld [vmem:[#allocation7 + $0x38] sm:$0xff]  ;;  %v149_v28 = vld [vmem:[#allocation5 + $0x50] sm:$0xff] }
  0x83   :  { %1061 = vmatprep.subr.bf16.mxu1 %v1386_v0  ;;  %v1047_v27 = vpack.c.bf16 %v148_v23, %v147_v22  ;;  %v150_v29 = vld [vmem:[#allocation5 + $0x58] sm:$0xff]  ;;  %v1068_v30 = vpack.c.bf16 %v239_v26, %v238_v25  ;;  %v240_v31 = vld [vmem:[#allocation7 + $0x40] sm:$0xff]  ;;  %v241_v32 = vld [vmem:[#allocation7 + $0x48] sm:$0xff] }
  0x84   :  { %1039 = vmatpush3.bf16.msra.mxu0 %v1038_v7  ;;  %v1050_v33 = vpack.c.bf16 %v150_v29, %v149_v28  ;;  %v151_v34 = vld [vmem:[#allocation5 + $0x60] sm:$0xff]  ;;  %v152_v35 = vld [vmem:[#allocation5 + $0x68] sm:$0xff]  ;;  %v1071_v36 = vpack.c.bf16 %v241_v32, %v240_v31  ;;  %v242_v37 = vld [vmem:[#allocation7 + $0x50] sm:$0xff] }
  0x85   :  { %1040 = vmatprep.subr.bf16.mxu0 %v1386_v0  ;;  %v243_v38 = vld [vmem:[#allocation7 + $0x58] sm:$0xff]  ;;  %v1053_v39 = vpack.c.bf16 %v152_v35, %v151_v34  ;;  %v153_v40 = vld [vmem:[#allocation5 + $0x70] sm:$0xff]  ;;  %v244_v43 = vld [vmem:[#allocation7 + $0x60] sm:$0xff] }
  0x86   :  { %1063 = vmatpush3.bf16.msra.mxu1 %v1062_v18  ;;  %v154_v41 = vld [vmem:[#allocation5 + $0x78] sm:$0xff]  ;;  %v1074_v42 = vpack.c.bf16 %v243_v38, %v242_v37  ;;  %v245_v44 = vld [vmem:[#allocation7 + $0x68] sm:$0xff]  ;;  %v246_v48 = vld [vmem:[#allocation7 + $0x70] sm:$0xff] }
  0x87   :  { %1064 = vmatprep.subr.bf16.mxu1 %v1386_v0  ;;  %v1056_v45 = vpack.c.bf16 %v154_v41, %v153_v40  ;;  %v1077_v46 = vpack.c.bf16 %v245_v44, %v244_v43  ;;  %v138_v47 = vld [vmem:[#allocation2] sm:$0xff]  ;;  %v325_v51 = vld [vmem:[#allocation8] sm:$0xff]  ;;  %v326_v52 = vld [vmem:[#allocation8 + $0x8] sm:$0xff] }
  0x88   :  { %1042 = vmatpush3.bf16.msra.mxu0 %v1041_v14  ;;  %v247_v49 = vld [vmem:[#allocation7 + $0x78] sm:$0xff]  ;;  %v327_v53 = vld [vmem:[#allocation8 + $0x10] sm:$0xff]  ;;  %v1083_v54 = vpack.c.bf16 %v326_v52, %v325_v51  ;;  %v329_v57 = vld [vmem:[#allocation8 + $0x20] sm:$0xff] }
  0x89   :  { %1043 = vmatprep.subr.bf16.mxu0 %v1386_v0  ;;  %v1080_v50 = vpack.c.bf16 %v247_v49, %v246_v48  ;;  %v328_v55 = vld [vmem:[#allocation8 + $0x18] sm:$0xff]  ;;  %v330_v58 = vld [vmem:[#allocation8 + $0x28] sm:$0xff]  ;;  %v331_v60 = vld [vmem:[#allocation8 + $0x30] sm:$0xff] }
  0x8a   :  { %1066 = vmatpush3.bf16.msra.mxu1 %v1065_v24  ;;  %v1086_v56 = vpack.c.bf16 %v328_v55, %v327_v53  ;;  %v1089_v59 = vpack.c.bf16 %v330_v58, %v329_v57  ;;  %v332_v61 = vld [vmem:[#allocation8 + $0x38] sm:$0xff]  ;;  %v333_v63 = vld [vmem:[#allocation8 + $0x40] sm:$0xff]  ;;  %v334_v2 = vld [vmem:[#allocation8 + $0x48] sm:$0xff] }
  0x8b   :  { %1067 = vmatprep.subr.bf16.mxu1 %v1386_v0  ;;  %v1092_v62 = vpack.c.bf16 %v332_v61, %v331_v60  ;;  %v1095_v3 = vpack.c.bf16 %v334_v2, %v333_v63  ;;  %v335_v4 = vld [vmem:[#allocation8 + $0x50] sm:$0xff]  ;;  %v336_v5 = vld [vmem:[#allocation8 + $0x58] sm:$0xff]  ;;  %v337_v7 = vld [vmem:[#allocation8 + $0x60] sm:$0xff] }
  0x8c   :  { %1045 = vmatpush3.bf16.msra.mxu0 %v1044_v21  ;;  %v1098_v6 = vpack.c.bf16 %v336_v5, %v335_v4  ;;  %v338_v8 = vld [vmem:[#allocation8 + $0x68] sm:$0xff]  ;;  %v716_v10 = vld [vmem:[%s1654_s2] ss:$0 sm:$0xff]  ;;  %v339_v14 = vld [vmem:[#allocation8 + $0x70] sm:$0xff] }
  0x8d   :  { %1046 = vmatprep.subr.bf16.mxu0 %v1386_v0  ;;  %v1101_v9 = vpack.c.bf16 %v338_v8, %v337_v7  ;;  %v340_v15 = vld [vmem:[#allocation8 + $0x78] sm:$0xff]  ;;  %v418_v17 = vld [vmem:[#allocation10] sm:$0xff]  ;;  %v419_v18 = vld [vmem:[#allocation10 + $0x8] sm:$0xff] }
  0x8e   :  { %1069 = vmatpush3.bf16.msra.mxu1 %v1068_v30  ;;  %v1104_v16 = vpack.c.bf16 %v340_v15, %v339_v14  ;;  %v420_v19 = vld [vmem:[#allocation10 + $0x10] sm:$0xff]  ;;  %v1107_v20 = vpack.c.bf16 %v419_v18, %v418_v17  ;;  %v421_v21 = vld [vmem:[#allocation10 + $0x18] sm:$0xff]  ;;  %v422_v23 = vld [vmem:[#allocation10 + $0x20] sm:$0xff] }
  0x8f   :  { %1070 = vmatprep.subr.bf16.mxu1 %v1386_v0  ;;  %v1110_v22 = vpack.c.bf16 %v421_v21, %v420_v19  ;;  %v423_v24 = vld [vmem:[#allocation10 + $0x28] sm:$0xff]  ;;  %v424_v26 = vld [vmem:[#allocation10 + $0x30] sm:$0xff]  ;;  %v426_v29 = vld [vmem:[#allocation10 + $0x40] sm:$0xff] }
  0x90   :  { %1048 = vmatpush3.bf16.msra.mxu0 %v1047_v27  ;;  %v1113_v25 = vpack.c.bf16 %v423_v24, %v422_v23  ;;  %v425_v27 = vld [vmem:[#allocation10 + $0x38] sm:$0xff]  ;;  %v427_v30 = vld [vmem:[#allocation10 + $0x48] sm:$0xff]  ;;  %v428_v32 = vld [vmem:[#allocation10 + $0x50] sm:$0xff] }
  0x91   :  { %1049 = vmatprep.subr.bf16.mxu0 %v1386_v0  ;;  %v1116_v28 = vpack.c.bf16 %v425_v27, %v424_v26  ;;  %v1119_v31 = vpack.c.bf16 %v427_v30, %v426_v29  ;;  %v430_v35 = vld [vmem:[#allocation10 + $0x60] sm:$0xff]  ;;  %v717_v38 = vld [vmem:[%s1656_s4] ss:$0 sm:$0xff]  ;;  %v516_v52 = vld [vmem:[#allocation11 + $0x28] sm:$0xff] }
  0x92   :  { %1072 = vmatpush3.bf16.msra.mxu1 %v1071_v36  ;;  %v431_v36 = vld [vmem:[#allocation10 + $0x68] sm:$0xff]  ;;  %v433_v43 = vld [vmem:[#allocation10 + $0x78] sm:$0xff]  ;;  %v515_v51 = vld [vmem:[#allocation11 + $0x20] sm:$0xff] }
  0x93   :  { %1073 = vmatprep.subr.bf16.mxu1 %v1386_v0  ;;  %v1125_v37 = vpack.c.bf16 %v431_v36, %v430_v35  ;;  %v514_v49 = vld [vmem:[#allocation11 + $0x18] sm:$0xff]  ;;  %v1137_v53 = vpack.c.bf16 %v516_v52, %v515_v51  ;;  %v519_v57 = vld [vmem:[#allocation11 + $0x40] sm:$0xff]  ;;  %v520_v58 = vld [vmem:[#allocation11 + $0x48] sm:$0xff] }
  0x94   :  { %1051 = vmatpush3.bf16.msra.mxu0 %v1050_v33  ;;  %v429_v33 = vld [vmem:[#allocation10 + $0x58] sm:$0xff]  ;;  %v521_v60 = vld [vmem:[#allocation11 + $0x50] sm:$0xff]  ;;  %v523_v63 = vld [vmem:[#allocation11 + $0x60] sm:$0xff] }
  0x95   :  { %1052 = vmatprep.subr.bf16.mxu0 %v1386_v0  ;;  %v1122_v34 = vpack.c.bf16 %v429_v33, %v428_v32  ;;  %v518_v55 = vld [vmem:[#allocation11 + $0x38] sm:$0xff]  ;;  %v524_v2 = vld [vmem:[#allocation11 + $0x68] sm:$0xff]  ;;  %v525_v8 = vld [vmem:[#allocation11 + $0x70] sm:$0xff] }
  0x96   :  { %1075 = vmatpush3.bf16.msra.mxu1 %v1074_v42  ;;  %v432_v42 = vld [vmem:[#allocation10 + $0x70] sm:$0xff]  ;;  %v522_v61 = vld [vmem:[#allocation11 + $0x58] sm:$0xff]  ;;  %v608_v17 = vld [vmem:[#allocation13 + $0x20] sm:$0xff] }
  0x97   :  { %1076 = vmatprep.subr.bf16.mxu1 %v1386_v0  ;;  %v1128_v44 = vpack.c.bf16 %v433_v43, %v432_v42  ;;  %v718_v4 = vld [vmem:[%s1658_s6] ss:$0 sm:$0xff]  ;;  %v609_v18 = vld [vmem:[#allocation13 + $0x28] sm:$0xff]  ;;  %v618_v35 = vld [vmem:[#allocation13 + $0x70] sm:$0xff] }
  0x98   :  { %1054 = vmatpush3.bf16.msra.mxu0 %v1053_v39  ;;  %v607_v15 = vld [vmem:[#allocation13 + $0x18] sm:$0xff]  ;;  %v1161_v19 = vpack.c.bf16 %v609_v18, %v608_v17  ;;  %v613_v23 = vld [vmem:[#allocation13 + $0x48] sm:$0xff] }
  0x99   :  { %1055 = vmatprep.subr.bf16.mxu0 %v1386_v0  ;;  %v615_v26 = vld [vmem:[#allocation13 + $0x58] sm:$0xff]  ;;  %v617_v29 = vld [vmem:[#allocation13 + $0x68] sm:$0xff] }
  0x9a   :  { %1078 = vmatpush3.bf16.msra.mxu1 %v1077_v46  ;;  %v512_v46 = vld [vmem:[#allocation11 + $0x8] sm:$0xff]  ;;  %v619_v36 = vld [vmem:[#allocation13 + $0x78] sm:$0xff] }
  0x9b   :  { %1079 = vmatprep.subr.bf16.mxu1 %v1386_v0 }
  0x9c   :  { %1057 = vmatpush3.bf16.msra.mxu0 %v1056_v45  ;;  %v511_v45 = vld [vmem:[#allocation11] sm:$0xff] }
  0x9d   :  { %1082 = vmatprep.subr.bf16.mxu0 %v1386_v0  ;;  %v1131_v48 = vpack.c.bf16 %v512_v46, %v511_v45 }
  0x9e   :  { %1081 = vmatpush3.bf16.msra.mxu1 %v1080_v50 }
  0x9f   :  { %857 = vmatmul.mubr.f32.vlgmr.msra.gmra.mrb[0].mxu0 %v138_v47  ;;  %1106 = vmatprep.subr.bf16.mxu1 %v1386_v0  ;;  %v513_v47 = vld [vmem:[#allocation11 + $0x10] sm:$0xff] }
  0xa0   :  { %926 = vmatprep.mubr.msk.f32.mxu0 %vm1387_vm0, %v1388_v1  ;;  %1084 = vmatpush3.bf16.msra.mxu0 %v1083_v54  ;;  %v1134_v50 = vpack.c.bf16 %v514_v49, %v513_v47  ;;  %v517_v54 = vld [vmem:[#allocation11 + $0x30] sm:$0xff] }
  0xa1   :  { %1085 = vmatprep.subr.bf16.mxu0 %v1386_v0 }
  0xa4   :  { %1087 = vmatpush3.bf16.msra.mxu0 %v1086_v56  ;;  %v1140_v56 = vpack.c.bf16 %v518_v55, %v517_v54 }
  0xa5   :  { %1088 = vmatprep.subr.bf16.mxu0 %v1386_v0 }
  0xa8   :  { %1090 = vmatpush3.bf16.msra.mxu0 %v1089_v59  ;;  %v1143_v59 = vpack.c.bf16 %v520_v58, %v519_v57 }
  0xa9   :  { %1091 = vmatprep.subr.bf16.mxu0 %v1386_v0 }
  0xac   :  { %1093 = vmatpush3.bf16.msra.mxu0 %v1092_v62  ;;  %v1146_v62 = vpack.c.bf16 %v522_v61, %v521_v60 }
  0xad   :  { %1094 = vmatprep.subr.bf16.mxu0 %v1386_v0 }
  0xb0   :  { %1096 = vmatpush3.bf16.msra.mxu0 %v1095_v3  ;;  %v1149_v3 = vpack.c.bf16 %v524_v2, %v523_v63 }
  0xb1   :  { %1097 = vmatprep.subr.bf16.mxu0 %v1386_v0 }
  0xb4   :  { %1099 = vmatpush3.bf16.msra.mxu0 %v1098_v6 }
  0xb5   :  { %1100 = vmatprep.subr.bf16.mxu0 %v1386_v0 }
  0xb8   :  { %1102 = vmatpush3.bf16.msra.mxu0 %v1101_v9  ;;  %v526_v9 = vld [vmem:[#allocation11 + $0x78] sm:$0xff] }
  0xb9   :  { %1103 = vmatprep.subr.bf16.mxu0 %v1386_v0 }
  0xbc   :  { %1105 = vmatpush3.bf16.msra.mxu0 %v1104_v16 }
  0xbd   :  { %1130 = vmatprep.subr.bf16.mxu0 %v1386_v0 }
 0x172   :  { %v228_v11 = vpop.f32.mrb[0].mxu0 }
 0x173   :  { %v229_v12 = vadd.f32 %v716_v10, %v228_v11  ;;  %v858_v13 = vpop.f32.mrb[1].mxu0  ;;  %v1152_v10 = vpack.c.bf16 %v526_v9, %v525_v8  ;;  %v604_v11 = vld [vmem:[#allocation13] sm:$0xff] }
 0x174   :  { %v606_v13 = vld [vmem:[#allocation13 + $0x10] sm:$0xff] }
 0x175   :  { %892 = vmatmul.mubr.f32.vlgmr.msra.gmra.mrb[0].mxu1 %v229_v12  ;;  %v605_v12 = vld [vmem:[#allocation13 + $0x8] sm:$0xff]  ;;  %v1158_v16 = vpack.c.bf16 %v607_v15, %v606_v13 }
 0x176   :  { %961 = vmatprep.mubr.msk.f32.mxu1 %vm1387_vm0, %v1388_v1  ;;  %1108 = vmatpush3.bf16.msra.mxu1 %v1107_v20  ;;  %v1155_v14 = vpack.c.bf16 %v605_v12, %v604_v11  ;;  %v611_v20 = vld [vmem:[#allocation13 + $0x38] sm:$0xff] }
 0x177   :  { %1109 = vmatprep.subr.bf16.mxu1 %v1386_v0 }
 0x17a   :  { %1111 = vmatpush3.bf16.msra.mxu1 %v1110_v22  ;;  %v612_v22 = vld [vmem:[#allocation13 + $0x40] sm:$0xff] }
 0x17b   :  { %1112 = vmatprep.subr.bf16.mxu1 %v1386_v0  ;;  %v1167_v24 = vpack.c.bf16 %v613_v23, %v612_v22 }
 0x17e   :  { %1114 = vmatpush3.bf16.msra.mxu1 %v1113_v25  ;;  %v614_v25 = vld [vmem:[#allocation13 + $0x50] sm:$0xff] }
 0x17f   :  { %1115 = vmatprep.subr.bf16.mxu1 %v1386_v0  ;;  %v1170_v27 = vpack.c.bf16 %v615_v26, %v614_v25 }
 0x182   :  { %1117 = vmatpush3.bf16.msra.mxu1 %v1116_v28  ;;  %v616_v28 = vld [vmem:[#allocation13 + $0x60] sm:$0xff] }
 0x183   :  { %1118 = vmatprep.subr.bf16.mxu1 %v1386_v0  ;;  %v1173_v30 = vpack.c.bf16 %v617_v29, %v616_v28 }
 0x186   :  { %1120 = vmatpush3.bf16.msra.mxu1 %v1119_v31  ;;  %v719_v31 = vld [vmem:[%s1660_s8] ss:$0 sm:$0xff]  ;;  %s1389_s8 = smov [#allocation14]  }
 0x187   :  { %1121 = vmatprep.subr.bf16.mxu1 %v1386_v0  ;;  %s704_s30 = sshll.u32 %s1389_s8, 4  ;;  %s705_s30 = int_to_ptr.vmem [resolvable:$true] %s704_s30 }
 0x188   :  { %s1345_s5 = scalar_lea.vmem %s705_s30, 128  ;;  %p1350_p1 = scmp.lt.s32.totalorder %s705_s30, %s705_s30 }
 0x189   :  { %p1346_p0 = scmp.ne.s32.totalorder %s705_s30, %s1345_s5  ;;  %p1351_p2 = scmp.lt.s32.totalorder %s1345_s5, %s1345_s5 }
 0x18a   :  { %1123 = vmatpush3.bf16.msra.mxu1 %v1122_v34 }
 0x18b   :  { %1124 = vmatprep.subr.bf16.mxu1 %v1386_v0  ;;  %p1352_p3 = por %p1351_p2, %p1350_p1 }
 0x18d   :  { %p1353_p4 = pnand %p1352_p3, %p1346_p0 }
 0x18e   :  { %1126 = vmatpush3.bf16.msra.mxu1 %v1125_v37  ;;  %v1176_v37 = vpack.c.bf16 %v619_v36, %v618_v35 }
 0x18f   :  { %1127 = vmatprep.subr.bf16.mxu1 %v1386_v0 }
 0x192   :  { %1129 = vmatpush3.bf16.msra.mxu1 %v1128_v44 }
 0x193   :  { %1154 = vmatprep.subr.bf16.mxu1 %v1386_v0 }
 0x248   :  { %v321_v39 = vpop.f32.mrb[0].mxu1 }
 0x249   :  { %v322_v40 = vadd.f32 %v717_v38, %v321_v39  ;;  %v893_v41 = vpop.f32.mrb[1].mxu1  ;;  %v720_v38 = vld [vmem:[%s1662_s10] ss:$0 sm:$0xff] }
 0x24b   :  { %927 = vmatmul.mubr.f32.vlgmr.msra.gmra.mrb[2].mxu0 %v322_v40 }
 0x24c   :  { %996 = vmatprep.mubr.msk.f32.mxu0 %vm1387_vm0, %v1388_v1  ;;  %1132 = vmatpush3.bf16.msra.mxu0 %v1131_v48 }
 0x24d   :  { %1133 = vmatprep.subr.bf16.mxu0 %v1386_v0 }
 0x250   :  { %1135 = vmatpush3.bf16.msra.mxu0 %v1134_v50 }
 0x251   :  { %1136 = vmatprep.subr.bf16.mxu0 %v1386_v0 }
 0x254   :  { %1138 = vmatpush3.bf16.msra.mxu0 %v1137_v53 }
 0x255   :  { %1139 = vmatprep.subr.bf16.mxu0 %v1386_v0 }
 0x258   :  { %1141 = vmatpush3.bf16.msra.mxu0 %v1140_v56 }
 0x259   :  { %1142 = vmatprep.subr.bf16.mxu0 %v1386_v0 }
 0x25c   :  { %1144 = vmatpush3.bf16.msra.mxu0 %v1143_v59 }
 0x25d   :  { %1145 = vmatprep.subr.bf16.mxu0 %v1386_v0 }
 0x260   :  { %1147 = vmatpush3.bf16.msra.mxu0 %v1146_v62 }
 0x261   :  { %1148 = vmatprep.subr.bf16.mxu0 %v1386_v0 }
 0x264   :  { %1150 = vmatpush3.bf16.msra.mxu0 %v1149_v3 }
 0x265   :  { %1151 = vmatprep.subr.bf16.mxu0 %v1386_v0 }
 0x268   :  { %1153 = vmatpush3.bf16.msra.mxu0 %v1152_v10 }
 0x31e   :  { %v414_v5 = vpop.f32.mrb[2].mxu0 }
 0x31f   :  { %v415_v6 = vadd.f32 %v718_v4, %v414_v5  ;;  %v928_v7 = vpop.f32.mrb[3].mxu0 }
 0x321   :  { %962 = vmatmul.mubr.f32.vlgmr.msra.gmra.mrb[2].mxu1 %v415_v6 }
 0x322   :  { %1031 = vmatprep.mubr.msk.f32.mxu1 %vm1387_vm0, %v1388_v1  ;;  %1156 = vmatpush3.bf16.msra.mxu1 %v1155_v14  ;;  %v610_v1 = vld [vmem:[#allocation13 + $0x30] sm:$0xff] }
 0x323   :  { %1157 = vmatprep.subr.bf16.mxu1 %v1386_v0  ;;  %v1164_v21 = vpack.c.bf16 %v611_v20, %v610_v1 }
 0x326   :  { %1159 = vmatpush3.bf16.msra.mxu1 %v1158_v16 }
 0x327   :  { %1160 = vmatprep.subr.bf16.mxu1 %v1386_v0 }
 0x32a   :  { %1162 = vmatpush3.bf16.msra.mxu1 %v1161_v19 }
 0x32b   :  { %1163 = vmatprep.subr.bf16.mxu1 %v1386_v0 }
 0x32e   :  { %1165 = vmatpush3.bf16.msra.mxu1 %v1164_v21 }
 0x32f   :  { %1166 = vmatprep.subr.bf16.mxu1 %v1386_v0 }
 0x332   :  { %1168 = vmatpush3.bf16.msra.mxu1 %v1167_v24 }
 0x333   :  { %1169 = vmatprep.subr.bf16.mxu1 %v1386_v0 }
 0x336   :  { %1171 = vmatpush3.bf16.msra.mxu1 %v1170_v27 }
 0x337   :  { %1172 = vmatprep.subr.bf16.mxu1 %v1386_v0 }
 0x33a   :  { %1174 = vmatpush3.bf16.msra.mxu1 %v1173_v30 }
 0x33b   :  { %1175 = vmatprep.subr.bf16.mxu1 %v1386_v0  ;;  %v721_v0 = vld [vmem:[%s1664_s12] ss:$0 sm:$0xff] }
 0x33e   :  { %1177 = vmatpush3.bf16.msra.mxu1 %v1176_v37 }
 0x3f4   :  { %v507_v32 = vpop.f32.mrb[2].mxu1 }
 0x3f5   :  { %v508_v33 = vadd.f32 %v719_v31, %v507_v32  ;;  %v963_v34 = vpop.f32.mrb[3].mxu1 }
 0x3f7   :  { %997 = vmatmul.mubr.f32.vlgmr.msra.gmra.mrb[4].mxu0 %v508_v33 }
 0x4ca   :  { %v600_v39 = vpop.f32.mrb[4].mxu0 }
 0x4cb   :  { %v601_v40 = vadd.f32 %v720_v38, %v600_v39  ;;  %v998_v41 = vpop.f32.mrb[5].mxu0 }
 0x4cd   :  { %1032 = vmatmul.mubr.f32.vlgmr.msra.gmra.mrb[4].mxu1 %v601_v40 }
 0x5a0   :  { %v693_v42 = vpop.f32.mrb[4].mxu1 }
 0x5a1   :  { %v694_v43 = vadd.f32 %v721_v0, %v693_v42  ;;  %v1033_v44 = vpop.f32.mrb[5].mxu1 }
 0x5a3   :  { %697 = vst [vmem:[#allocation14] sm:$0xff] %v694_v43 }
 0x5a4   :  { %1356 = shalt.err (!%p1353_p4)
}
 0x5a5   :  { %s1357_s1 = scalar_lea.hbm %s1665_s13, 128 }
 0x5a6   :  { %p1358_p5 = scmp.ne.s32.totalorder %s1665_s13, %s1357_s1  ;;  %p1361_p6 = scmp.lt.u32.totalorder %s1357_s1, %s1665_s13 }
 0x5a8   :  { %p1363_p7 = pnand %p1361_p6, %p1358_p5 }
 0x5aa   :  { %1366 = shalt.err (!%p1363_p7)
}
 0x5ab   :  { %707 = dma.vmem_to_hbm [thread:$0]  %s705_s30, 128, %s1665_s13, [#allocation4]  }
 0x5ac   :  { %1375 = dma.done.wait [#allocation4], 128  }
 0x5ad   :  { %1376 = vsyncadd [#allocation4], 4294967168 }
 0x5ae   :  { %711 = vsyncpa [#allocation3], 1 }
 0x5af   :  { %712 = vsyncpa [#allocation6], 1 }
 0x5b0   :  { %713 = vsyncpa [#allocation9], 1 }
 0x5b1   :  { %714 = vsyncpa [#allocation12], 1 }
 0x5b2   :  { %715 = vsyncpa [#allocation4], 1 }

</bundles_post_ra>
